<compile_context>
chip_gen: v5e
topology: v5e:2x2
jax: 0.10.0
libtpu: 0.0.40
codegen_flags: <defaults>
</compile_context>

<pallas_src>
import jax
import jax.numpy as jnp
from jax.experimental import pallas as pl
from jax.experimental.pallas import tpu as pltpu  # noqa: F401  (kept for TPU-specific params if needed)

LANE = 128
SUBLANE = 8


def _round_up(x, m):
    return (x + m - 1) // m * m


def neher_kernel(x_ref, vir_ref, vac_ref, params_ref, vac_b_ref, vir_b_ref, o_ref):
    # ReLU on the VPU, then a single MXU matmul with f32 accumulation.
    w = jnp.maximum(params_ref[...], 0.0)
    logits = jnp.dot(x_ref[...], w, preferred_element_type=jnp.float32)

    # Bias terms as VPU multiply + cross-lane reduce (XLU) — no near-empty
    # MXU round trips for K<=6, N=1. Bias rows are lane-major (1, N) and
    # broadcast against the (B, N) one-hot indicator matrices.
    vac_bias = jnp.sum(vac_ref[...] * vac_b_ref[...], axis=1, keepdims=True)
    vir_bias = jnp.sum(vir_ref[...] * vir_b_ref[...], axis=1, keepdims=True)

    # Broadcast the (B, 1) biases over the (lane-padded) output dim.
    o_ref[...] = (logits + vac_bias + vir_bias).astype(o_ref.dtype)


def neher_forward(input_tensor, virus_indicator, vaccine_indicator,
                  params, vaccine_bias, virus_bias):
    B, F = input_tensor.shape
    F2, O = params.shape
    assert F == F2
    Nvac = vaccine_bias.shape[0]
    Nvir = virus_bias.shape[0]

    # Lane-dense output (unmasked stores) + sublane-aligned batch.
    # Zero-padded weight columns stay zero through ReLU/matmul; padded batch
    # rows are all-zero inputs. Both are sliced off below.
    O_pad = _round_up(O, LANE)
    B_pad = _round_up(B, SUBLANE)

    params_p = params if O_pad == O else jnp.pad(params, ((0, 0), (0, O_pad - O)))
    if B_pad != B:
        pad_b = ((0, B_pad - B), (0, 0))
        input_tensor = jnp.pad(input_tensor, pad_b)
        virus_indicator = jnp.pad(virus_indicator, pad_b)
        vaccine_indicator = jnp.pad(vaccine_indicator, pad_b)

    # Lane-major bias rows: (1, N) instead of (N, 1).
    vac_b_row = vaccine_bias.reshape(1, Nvac)
    vir_b_row = virus_bias.reshape(1, Nvir)

    full = lambda shape: pl.BlockSpec(shape, lambda: (0,) * len(shape))

    cost = pl.CostEstimate(
        flops=2 * B_pad * F * O_pad + 4 * B_pad * (Nvac + Nvir),
        transcendentals=0,
        bytes_accessed=4 * (B_pad * F + F * O_pad + B_pad * (Nvac + Nvir)
                            + Nvac + Nvir + B_pad * O_pad),
    )

    out_padded = pl.pallas_call(
        neher_kernel,
        out_shape=jax.ShapeDtypeStruct((B_pad, O_pad), jnp.float32),
        grid=(),
        in_specs=[
            full((B_pad, F)),      # input_tensor
            full((B_pad, Nvir)),   # virus_indicator
            full((B_pad, Nvac)),   # vaccine_indicator
            full((F, O_pad)),      # params (zero-padded on O)
            full((1, Nvac)),       # vaccine_bias row
            full((1, Nvir)),       # virus_bias row
        ],
        out_specs=full((B_pad, O_pad)),
        cost_estimate=cost,
    )(input_tensor, virus_indicator, vaccine_indicator,
      params_p, vac_b_row, vir_b_row)

    return out_padded[:B, :O]


if __name__ == "__main__":
    # Small, module-consistent shapes.
    B = 8            # batch of (vaccine, virus) pairs
    num_feats = 32
    output_dim = 16
    num_vaccines = 4
    num_virus = 6

    key = jax.random.PRNGKey(0)
    k_params, k_vacb, k_virb, k_x, k_vac, k_vir = jax.random.split(key, 6)

    # Deterministic "randn"-style parameter init (mirrors nn.Parameter(torch.randn(...))).
    params = jax.random.normal(k_params, (num_feats, output_dim), dtype=jnp.float32)
    vaccine_bias = jax.random.normal(k_vacb, (num_vaccines, 1), dtype=jnp.float32)
    virus_bias = jax.random.normal(k_virb, (num_virus, 1), dtype=jnp.float32)

    # Example inputs: features + one-hot indicator matrices (as the forward implies).
    input_tensor = jax.random.normal(k_x, (B, num_feats), dtype=jnp.float32)
    vac_idx = jax.random.randint(k_vac, (B,), 0, num_vaccines)
    vir_idx = jax.random.randint(k_vir, (B,), 0, num_virus)
    vaccine_indicator = jax.nn.one_hot(vac_idx, num_vaccines, dtype=jnp.float32)
    virus_indicator = jax.nn.one_hot(vir_idx, num_virus, dtype=jnp.float32)

    out = neher_forward(input_tensor, virus_indicator, vaccine_indicator,
                        params, vaccine_bias, virus_bias)
    out = jax.block_until_ready(out)

    # Reference check in plain JAX f32 (same math as the PyTorch forward).
    # The MXU may run the f32 matmul via bf16 passes at default precision,
    # so allow a modest tolerance; bias math is exact f32.
    ref = (input_tensor @ jnp.maximum(params, 0.0)
           + vaccine_indicator @ vaccine_bias
           + virus_indicator @ virus_bias)
    assert out.shape == (B, output_dim)
    assert jnp.allclose(out, ref, atol=1e-1, rtol=1e-2), \
        f"max abs err {float(jnp.max(jnp.abs(out - ref)))}"

    print("KERNEL_OK")
</pallas_src>

<mosaic_0001>
module attributes {stable_mosaic.version = 11 : i64} {
  func.func @neher_kernel(%arg0: memref<8x32xf32, #tpu.memory_space<vmem>>, %arg1: memref<8x6xf32, #tpu.memory_space<vmem>>, %arg2: memref<8x4xf32, #tpu.memory_space<vmem>>, %arg3: memref<32x128xf32, #tpu.memory_space<vmem>>, %arg4: memref<1x4xf32, #tpu.memory_space<vmem>>, %arg5: memref<1x6xf32, #tpu.memory_space<vmem>>, %arg6: memref<8x128xf32, #tpu.memory_space<vmem>>) attributes {dimension_semantics = [], scalar_prefetch = 0 : i64, scratch_operands = 0 : i64, tpu.core_type = #tpu.core_type<tc>} {
    %c0 = arith.constant 0 : index
    %c0_0 = arith.constant 0 : index
    %0 = vector.load %arg3[%c0, %c0_0] : memref<32x128xf32, #tpu.memory_space<vmem>>, vector<32x128xf32>
    %cst = arith.constant 0.000000e+00 : f32
    %1 = vector.broadcast %cst : f32 to vector<32x128xf32>
    %2 = arith.maximumf %0, %1 : vector<32x128xf32>
    %c0_1 = arith.constant 0 : index
    %c0_2 = arith.constant 0 : index
    %3 = vector.load %arg0[%c0_1, %c0_2] : memref<8x32xf32, #tpu.memory_space<vmem>>, vector<8x32xf32>
    %cst_3 = arith.constant dense<0.000000e+00> : vector<8x128xf32>
    %4 = tpu.matmul %3, %2, %cst_3 {dimension_numbers = #tpu.dot_dimension_numbers<[1], [0], [0], [1], [0, 0, 1, 1], [], []>} : vector<8x32xf32>, vector<32x128xf32>, vector<8x128xf32> -> vector<8x128xf32>
    %c0_4 = arith.constant 0 : index
    %c0_5 = arith.constant 0 : index
    %5 = vector.load %arg2[%c0_4, %c0_5] : memref<8x4xf32, #tpu.memory_space<vmem>>, vector<8x4xf32>
    %c0_6 = arith.constant 0 : index
    %c0_7 = arith.constant 0 : index
    %6 = vector.load %arg4[%c0_6, %c0_7] : memref<1x4xf32, #tpu.memory_space<vmem>>, vector<1x4xf32>
    %7 = vector.broadcast %6 : vector<1x4xf32> to vector<8x4xf32>
    %8 = arith.mulf %5, %7 : vector<8x4xf32>
    %cst_8 = arith.constant dense<0.000000e+00> : vector<8xf32>
    %9 = vector.multi_reduction <add>, %8, %cst_8 [1] : vector<8x4xf32> to vector<8xf32>
    %10 = vector.shape_cast %9 : vector<8xf32> to vector<8x1xf32>
    %c0_9 = arith.constant 0 : index
    %c0_10 = arith.constant 0 : index
    %11 = vector.load %arg1[%c0_9, %c0_10] : memref<8x6xf32, #tpu.memory_space<vmem>>, vector<8x6xf32>
    %c0_11 = arith.constant 0 : index
    %c0_12 = arith.constant 0 : index
    %12 = vector.load %arg5[%c0_11, %c0_12] : memref<1x6xf32, #tpu.memory_space<vmem>>, vector<1x6xf32>
    %13 = vector.broadcast %12 : vector<1x6xf32> to vector<8x6xf32>
    %14 = arith.mulf %11, %13 : vector<8x6xf32>
    %cst_13 = arith.constant dense<0.000000e+00> : vector<8xf32>
    %15 = vector.multi_reduction <add>, %14, %cst_13 [1] : vector<8x6xf32> to vector<8xf32>
    %16 = vector.shape_cast %15 : vector<8xf32> to vector<8x1xf32>
    %17 = vector.broadcast %10 : vector<8x1xf32> to vector<8x128xf32>
    %18 = arith.addf %4, %17 : vector<8x128xf32>
    %19 = vector.broadcast %16 : vector<8x1xf32> to vector<8x128xf32>
    %20 = arith.addf %18, %19 : vector<8x128xf32>
    %c0_14 = arith.constant 0 : index
    %c0_15 = arith.constant 0 : index
    %21 = vector.load %arg6[%c0_14, %c0_15] : memref<8x128xf32, #tpu.memory_space<vmem>>, vector<8x128xf32>
    tpu.vector_store %arg6[%c0_14, %c0_15], %20 {strides = array<i32>} : memref<8x128xf32, #tpu.memory_space<vmem>>, vector<8x128xf32>,
    return
  }
}

</mosaic_0001>

<bundles_post_ra>
// kernel: tpu_custom_call.1
= control target key start
LH: loop header
LB: loop body
LE: loop exit
PB: predicated region body
PF: predicated region fallthrough
CT: control target
= control target key end

     0   :  { %11 = vsyncpa [#allocation3], 0  ;;  %s274_s0 = inlined_call_operand.vmem [shape: f32[8,32], index: 0, kind: input, shape index: {}]   ;;  %s275_s1 = inlined_call_operand.hbm [shape: f32[8,6], index: 1, kind: input, shape index: {}]   ;;  %s276_s2 = inlined_call_operand.vmem [shape: f32[8,4], index: 2, kind: input, shape index: {}]   ;;  %s277_s3 = inlined_call_operand.hbm [shape: f32[32,128], index: 3, kind: input, shape index: {}]   ;;  %s278_s4 = inlined_call_operand.vmem [shape: f32[1,4], index: 4, kind: input, shape index: {}]   ;;  %s279_s5 = inlined_call_operand.vmem [shape: f32[1,6], index: 5, kind: input, shape index: {}]   ;;  %s280_s6 = inlined_call_operand.hbm [shape: f32[8,128], index: 6, kind: output, shape index: {}]  }
   0x1   :  { %12 = vsyncpa [#allocation6], 0 }
   0x2   :  { %13 = vsyncpa [#allocation4], 0  ;;  %s21_s23 = sshll.u32 %s275_s1, 4  ;;  %s213_s24 = smov [#allocation2]   ;;  %s22_s23 = int_to_ptr.hbm [resolvable:$true] %s21_s23 }
   0x3   :  { %s23_s25 = sshll.u32 %s213_s24, 4  ;;  %s33_s28 = sshll.u32 %s277_s3, 4  ;;  %s24_s25 = int_to_ptr.vmem [resolvable:$true] %s23_s25  ;;  %s34_s28 = int_to_ptr.hbm [resolvable:$true] %s33_s28 }
   0x4   :  { %26 = dma.hbm_to_vmem [thread:$0]  %s22_s23, 128, %s24_s25, [#allocation3]  }
   0x5   :  { %s214_s29 = smov [#allocation5]   ;;  %s215_s7 = smov 128  }
   0x6   :  { %s35_s30 = sshll.u32 %s214_s29, 4  ;;  %s216_s8 = smov 8   ;;  %s36_s30 = int_to_ptr.vmem [resolvable:$true] %s35_s30 }
   0x7   :  { %41 = dma.hbm_to_vmem [thread:$0]  %s34_s28, 512, %s36_s30, [#allocation6], %s215_s7, %s215_s7, %s216_s8  }
   0x8   :  { %207 = dma.done.wait [#allocation3], 128  }
   0x9   :  { %208 = vsyncadd [#allocation3], 4294967168 }
   0xa   :  { %209 = dma.done.wait [#allocation6], 512  }
   0xb   :  { %210 = vsyncadd [#allocation6], 4294966784  ;;  %v57_v0 = vld [vmem:[#allocation5 + $0x18] sm:$0xff]  ;;  %v56_v1 = vld [vmem:[#allocation5 + $0x10] sm:$0xff]  ;;  %vm69_vm0 = vcmask 31744   ;;  %vm83_vm1 = vcmask 261120  }
   0xc   :  { %v55_v2 = vld [vmem:[#allocation5 + $0x8] sm:$0xff]  ;;  %v61_v3 = vmax.f32 %v57_v0, 0.0  ;;  %v60_v4 = vmax.f32 %v56_v1, 0.0  ;;  %v63_v5 = vld [vmem:[%s276_s2] sm:$0xff]  ;;  %v54_v6 = vld [vmem:[#allocation5] sm:$0xff]  ;;  %vm79_vm2 = vcmask 48128  }
   0xd   :  { %v133_v7 = vld [vmem:[%s278_s4] ss:$0 sm:$0xff]  ;;  %v59_v8 = vmax.f32 %v55_v2, 0.0  ;;  %v58_v11 = vmax.f32 %v54_v6, 0.0  ;;  %s217_s4 = smov [#allocation7]   ;;  %s116_s16 = sshll.u32 %s280_s6, 4  ;;  %s117_s16 = int_to_ptr.hbm [resolvable:$true] %s116_s16 }
   0xe   :  { %99 = vmatpush.msra.mxu0 %v61_v3  ;;  %v68_v9 = vmul.f32 %v133_v7, %v63_v5  ;;  %v134_v10 = vld [vmem:[%s279_s5] ss:$0 sm:$0xff]  ;;  %s114_s5 = sshll.u32 %s217_s4, 4  ;;  %s115_s5 = int_to_ptr.vmem [resolvable:$true] %s114_s5 }
   0xf   :  { %v73_v12 = vld [vmem:[#allocation2] sm:$0xff] }
  0x10   :  { %100 = vmatpush.msra.mxu0 %v60_v4  ;;  %v70_v13 = vsel %vm69_vm0, %v68_v9, 0.0  ;;  %v62_v14 = vld [vmem:[%s274_s0] sm:$0xff]  ;;  %v78_v15 = vmul.f32 %v134_v10, %v73_v12 }
  0x11   :  { %71 = vadd.xlane.f32.xlu0 %v70_v13 }
  0x12   :  { %101 = vmatpush.msra.mxu0 %v59_v8  ;;  %v80_v16 = vsel %vm79_vm2, %v78_v15, 0.0 }
  0x14   :  { %102 = vmatpush.msra.mxu0 %v58_v11 }
  0x15   :  { %127 = vmatmul.msk.f32.vlgmr.msra.gmra.mxu0 %vm83_vm1, %v62_v14 }
  0x19   :  { %81 = vadd.xlane.f32.xlu0 %v80_v16 }
  0x84   :  { %v72_v17 = vpop.xlane.xlu0 %71 }
  0x8c   :  { %v82_v19 = vpop.xlane.xlu0 %81 }
  0x92   :  { %v104_v18 = vpop.f32.mrf.mxu0 }
  0x93   :  { %v105_v20 = vadd.f32 %v104_v18, %v72_v17 }
  0x95   :  { %v107_v21 = vadd.f32 %v105_v20, %v82_v19 }
  0x97   :  { %108 = vst [vmem:[#allocation7] sm:$0xff] %v107_v21 }
  0x98   :  { %119 = dma.vmem_to_hbm [thread:$0]  %s115_s5, 128, %s117_s16, [#allocation4]  }
  0x99   :  { %211 = dma.done.wait [#allocation4], 128  }
  0x9a   :  { %212 = vsyncadd [#allocation4], 4294967168 }
  0x9b   :  { %124 = vsyncpa [#allocation3], 1 }
  0x9c   :  { %125 = vsyncpa [#allocation6], 1 }
  0x9d   :  { %126 = vsyncpa [#allocation4], 1 }

</bundles_post_ra>
